<compile_context>
chip_gen: v5e
topology: v5e:2x2
jax: 0.10.0
libtpu: 0.0.40
codegen_flags: <defaults>
</compile_context>

<pallas_src>
import functools

import jax
import jax.numpy as jnp
from jax.experimental import pallas as pl
from jax.experimental.pallas import tpu as pltpu

GAMMA_NEG = 4.0
GAMMA_POS = 1.0
CLIP = 0.05
EPS = 1e-8


def _ipow(v, n):
    """v ** n for a small non-negative integer n via exponentiation by squaring."""
    if n == 0:
        return jnp.ones_like(v)
    result = None
    base = v
    while n:
        if n & 1:
            result = base if result is None else result * base
        n >>= 1
        if n:
            base = base * base
    return result


def _asl_kernel(x_ref, y_ref, out_ref, acc_ref, *, use_int_pow):
    j = pl.program_id(1)

    @pl.when(j == 0)
    def _():
        acc_ref[...] = jnp.zeros_like(acc_ref)

    bn, bc = x_ref.shape
    x = x_ref[...].astype(jnp.float32)
    y = y_ref[...].astype(jnp.float32)

    # xs_pos = x (module skips sigmoid); xs_neg = (1 - x + clip).clamp(max=1)
    xs_neg = jnp.minimum((1.0 - x) + CLIP, 1.0)

    if use_int_pow:
        # y in {0, 1} and integer gammas: one select, ONE log, integer powers.
        is_pos = y > 0.5
        p = jnp.where(is_pos, x, xs_neg)
        log_p = jnp.log(jnp.maximum(p, EPS))
        b = 1.0 - p                      # y=1 -> 1-xs_pos ; y=0 -> 1-xs_neg
        w = jnp.where(is_pos,
                      _ipow(b, int(round(GAMMA_POS))),
                      _ipow(b, int(round(GAMMA_NEG))))
        contrib = log_p * w
    else:
        # General (soft-label) formula, identical to the PyTorch forward.
        anti = 1.0 - y
        loss = y * jnp.log(jnp.maximum(x, EPS)) \
             + anti * jnp.log(jnp.maximum(xs_neg, EPS))
        base = 1.0 - x * y - xs_neg * anti
        gamma = GAMMA_POS * y + GAMMA_NEG * anti
        contrib = loss * jnp.power(base, gamma)

    # Fold the class axis into a (bn, 128) f32 accumulator: pure VPU adds
    # (the reduced axis is not the lane axis), far less acc ld/st traffic.
    if bc > 128:
        folded = contrib.reshape(bn, bc // 128, 128).sum(axis=1)
    else:
        folded = contrib
    acc_ref[...] += folded

    @pl.when(j == pl.num_programs(1) - 1)
    def _():
        s = jnp.sum(acc_ref[...])          # single cross-lane reduce per batch tile
        # Lane-dense (1, 8, 128) partial output for this batch tile.
        out_ref[...] = jnp.full(out_ref.shape, s, dtype=out_ref.dtype)


def _round_up(v, m):
    return ((v + m - 1) // m) * m


def _min_sublane(dtype):
    # Packed sub-32-bit dtypes want second-minor multiples of 8 * pack_factor.
    return 8 * max(1, 4 // jnp.dtype(dtype).itemsize)


def asymmetric_loss_optimized(x, y, *, block_n=None, block_c=None,
                              assume_binary_targets=True):
    """x: (N, C) 'logits' used as probabilities (module skips sigmoid),
       y: (N, C) multi-label targets -> scalar loss.

    Inputs are consumed in their given dtype (pass bf16 x / int8 y to halve HBM
    traffic); all math is f32 inside the kernel.
    assume_binary_targets=True requires y in {0, 1}; pass False for soft labels.
    """
    assert x.shape == y.shape and x.ndim == 2
    n, c = x.shape
    x_bytes = jnp.dtype(x.dtype).itemsize
    y_bytes = jnp.dtype(y.dtype).itemsize

    # Fast path only when targets are binary AND gammas are non-negative ints;
    # otherwise fall back to the exact general formula.
    use_int_pow = (assume_binary_targets
                   and float(GAMMA_POS).is_integer() and GAMMA_POS >= 0
                   and float(GAMMA_NEG).is_integer() and GAMMA_NEG >= 0)

    # Generation-aware VMEM budget (leave ~20% headroom below physical VMEM).
    try:
        info = pltpu.get_tpu_info()
        vmem_cap = int(getattr(info, "vmem_capacity_bytes", 64 << 20))
    except Exception:  # interpret mode / older runtimes
        vmem_cap = 64 << 20
    vmem_budget = max(32 << 20, (vmem_cap * 4) // 5)

    # Class tile: multiple of 128 lanes; pad C up to it.
    if block_c is not None:
        bc = int(block_c)
    else:
        c128 = _round_up(c, 128)
        bc = 128
        for cand in (2048, 1024, 512, 256):
            if c128 % cand == 0:
                bc = cand
                break
    assert bc % 128 == 0
    c_pad = _round_up(c, bc)

    # Batch tile: sized from a per-generation per-input byte cap, kept at
    # <= ceil(N/2) so the "parallel" batch axis has >= 2 steps (v7x megacore).
    min_bn = max(_min_sublane(x.dtype), _min_sublane(y.dtype))
    if block_n is not None:
        bn = int(block_n)
        assert bn % 8 == 0
    else:
        per_input_cap = (16 << 20) if vmem_cap >= (96 << 20) else (8 << 20)
        elem_cap = max(min_bn * bc, per_input_cap // max(x_bytes, y_bytes))
        bn_cap = max(min_bn, (elem_cap // bc) // min_bn * min_bn)
        half_n = _round_up((n + 1) // 2, min_bn)
        bn = max(min_bn, min(bn_cap, half_n))
    n_pad = _round_up(n, bn)

    # Zero-pad ragged shapes: padded elements (x=0, y=0) contribute exactly 0
    # (log(clamp(1.05, max=1)) = 0 and (1 - 0 - 1)^gamma = 0).
    if (n_pad, c_pad) != (n, c):
        x = jnp.pad(x, ((0, n_pad - n), (0, c_pad - c)))
        y = jnp.pad(y, ((0, n_pad - n), (0, c_pad - c)))

    gm, gc = n_pad // bn, c_pad // bc

    tile_in_bytes = bn * bc * (x_bytes + y_bytes)
    acc_bytes = bn * 128 * 4
    vmem_need = 2 * tile_in_bytes + acc_bytes + (4 << 20)   # 2x pipeline buffers
    vmem_limit = int(min(max(vmem_need, 32 << 20), vmem_budget))

    kernel = functools.partial(_asl_kernel, use_int_pow=use_int_pow)

    partials = pl.pallas_call(
        kernel,
        out_shape=jax.ShapeDtypeStruct((gm, 8, 128), jnp.float32),
        grid_spec=pltpu.PrefetchScalarGridSpec(
            num_scalar_prefetch=0,
            grid=(gm, gc),
            in_specs=[
                pl.BlockSpec((bn, bc), lambda i, j: (i, j)),
                pl.BlockSpec((bn, bc), lambda i, j: (i, j)),
            ],
            out_specs=pl.BlockSpec((1, 8, 128), lambda i, j: (i, 0, 0)),
            scratch_shapes=[pltpu.VMEM((bn, 128), jnp.float32)],
        ),
        compiler_params=pltpu.CompilerParams(
            dimension_semantics=("parallel", "arbitrary"),
            vmem_limit_bytes=vmem_limit,
        ),
    )(x, y)

    # Each (8,128) partial block is filled with one per-batch-tile value.
    return -jnp.sum(partials[:, 0, 0])


def _reference(x, y):
    # Pure-JAX reference mirroring the PyTorch forward exactly (f32 math).
    x = x.astype(jnp.float32)
    y = y.astype(jnp.float32)
    anti = 1.0 - y
    xs_pos = x
    xs_neg = jnp.minimum(1.0 - x + CLIP, 1.0)
    loss = y * jnp.log(jnp.maximum(xs_pos, EPS)) + anti * jnp.log(jnp.maximum(xs_neg, EPS))
    w = jnp.power(1.0 - xs_pos * y - xs_neg * anti, GAMMA_POS * y + GAMMA_NEG * anti)
    return -jnp.sum(loss * w)


if __name__ == "__main__":
    key = jax.random.PRNGKey(0)
    kx, ky, ks, kt = jax.random.split(key, 4)

    # Case 1: narrow dtypes straight into the kernel (bf16 probs, int8 binary
    # targets), auto tiling -> multi-tile grid with >= 2 batch-grid steps.
    N, C = 64, 256
    x1 = jax.nn.sigmoid(jax.random.normal(kx, (N, C), dtype=jnp.float32)).astype(jnp.bfloat16)
    y1 = (jax.random.uniform(ky, (N, C)) > 0.7).astype(jnp.int8)
    out1 = jax.block_until_ready(asymmetric_loss_optimized(x1, y1, block_c=128))
    ref1 = _reference(x1, y1)
    assert jnp.allclose(out1, ref1, rtol=1e-3, atol=5e-2), (out1, ref1)

    # Case 2: VOC-like shape (20 classes) -> exercises zero-padding of the
    # ragged class dim (20 -> 128) and the batch dim, f32 inputs.
    N2, C2 = 16, 20
    x2 = jax.nn.sigmoid(jax.random.normal(ks, (N2, C2), dtype=jnp.float32))
    y2 = (jax.random.uniform(jax.random.fold_in(ky, 1), (N2, C2)) > 0.7).astype(jnp.float32)
    out2 = jax.block_until_ready(asymmetric_loss_optimized(x2, y2))
    ref2 = _reference(x2, y2)
    assert jnp.allclose(out2, ref2, rtol=1e-4, atol=1e-2), (out2, ref2)

    # Case 3: soft labels exercise the general (non-binary) formula path.
    xs = jax.nn.sigmoid(jax.random.normal(kt, (N, C), dtype=jnp.float32))
    ysoft = jax.random.uniform(jax.random.fold_in(ky, 2), (N, C), dtype=jnp.float32)
    out3 = jax.block_until_ready(
        asymmetric_loss_optimized(xs, ysoft, assume_binary_targets=False))
    ref3 = _reference(xs, ysoft)
    assert jnp.allclose(out3, ref3, rtol=1e-4, atol=1e-2), (out3, ref3)

    print("KERNEL_OK")
</pallas_src>

<mosaic_0001>
module attributes {stable_mosaic.version = 11 : i64} {
  func.func @_asl_kernel(%arg0: i32, %arg1: i32, %arg2: memref<32x128xbf16, #tpu.memory_space<vmem>>, %arg3: memref<32x128xi8, #tpu.memory_space<vmem>>, %arg4: memref<1x8x128xf32, #tpu.memory_space<vmem>>, %arg5: memref<32x128xf32, #tpu.memory_space<vmem>>) attributes {dimension_semantics = [#tpu.dimension_semantics<parallel>, #tpu.dimension_semantics<arbitrary>], iteration_bounds = array<i64: 2, 2>, scalar_prefetch = 0 : i64, scratch_operands = 1 : i64, tpu.core_type = #tpu.core_type<tc>, window_params = [{transform_indices = @transform_0, window_bounds = array<i64: 32, 128>}, {transform_indices = @transform_1, window_bounds = array<i64: 32, 128>}, {transform_indices = @transform_2, window_bounds = array<i64: 1, 8, 128>}]} {
    %c0_i32 = arith.constant 0 : i32
    %0 = arith.cmpi eq, %arg1, %c0_i32 : i32
    %1 = arith.extui %0 : i1 to i32
    %c0_i32_0 = arith.constant 0 : i32
    %2 = arith.cmpi ne, %1, %c0_i32_0 : i32
    scf.if %2 {
      %cst_14 = arith.constant 0.000000e+00 : f32
      %31 = vector.broadcast %cst_14 : f32 to vector<32x128xf32>
      %c0_15 = arith.constant 0 : index
      %c0_16 = arith.constant 0 : index
      %32 = vector.load %arg5[%c0_15, %c0_16] : memref<32x128xf32, #tpu.memory_space<vmem>>, vector<32x128xf32>
      tpu.vector_store %arg5[%c0_15, %c0_16], %31 {strides = array<i32>} : memref<32x128xf32, #tpu.memory_space<vmem>>, vector<32x128xf32>,
    } else {
    }
    %c0 = arith.constant 0 : index
    %c0_1 = arith.constant 0 : index
    %3 = vector.load %arg2[%c0, %c0_1] : memref<32x128xbf16, #tpu.memory_space<vmem>>, vector<32x128xbf16>
    %4 = arith.extf %3 : vector<32x128xbf16> to vector<32x128xf32>
    %c0_2 = arith.constant 0 : index
    %c0_3 = arith.constant 0 : index
    %5 = vector.load %arg3[%c0_2, %c0_3] : memref<32x128xi8, #tpu.memory_space<vmem>>, vector<32x128xi8>
    %6 = arith.sitofp %5 : vector<32x128xi8> to vector<32x128xf32>
    %cst = arith.constant 1.000000e+00 : f32
    %7 = vector.broadcast %cst : f32 to vector<32x128xf32>
    %8 = arith.subf %7, %4 : vector<32x128xf32>
    %cst_4 = arith.constant 5.000000e-02 : f32
    %9 = vector.broadcast %cst_4 : f32 to vector<32x128xf32>
    %10 = arith.addf %8, %9 : vector<32x128xf32>
    %cst_5 = arith.constant 1.000000e+00 : f32
    %11 = vector.broadcast %cst_5 : f32 to vector<32x128xf32>
    %12 = arith.minimumf %10, %11 : vector<32x128xf32>
    %cst_6 = arith.constant 5.000000e-01 : f32
    %13 = vector.broadcast %cst_6 : f32 to vector<32x128xf32>
    %14 = arith.cmpf ogt, %6, %13 : vector<32x128xf32>
    %15 = arith.select %14, %4, %12 : vector<32x128xi1>, vector<32x128xf32>
    %cst_7 = arith.constant 9.99999993E-9 : f32
    %16 = vector.broadcast %cst_7 : f32 to vector<32x128xf32>
    %17 = arith.maximumf %15, %16 : vector<32x128xf32>
    %18 = math.log %17 : vector<32x128xf32>
    %cst_8 = arith.constant 1.000000e+00 : f32
    %19 = vector.broadcast %cst_8 : f32 to vector<32x128xf32>
    %20 = arith.subf %19, %15 : vector<32x128xf32>
    %21 = arith.mulf %20, %20 : vector<32x128xf32>
    %22 = arith.mulf %21, %21 : vector<32x128xf32>
    %23 = arith.select %14, %20, %22 : vector<32x128xi1>, vector<32x128xf32>
    %24 = arith.mulf %18, %23 : vector<32x128xf32>
    %c0_9 = arith.constant 0 : index
    %c0_10 = arith.constant 0 : index
    %25 = vector.load %arg5[%c0_9, %c0_10] : memref<32x128xf32, #tpu.memory_space<vmem>>, vector<32x128xf32>
    %26 = arith.addf %25, %24 : vector<32x128xf32>
    %c0_11 = arith.constant 0 : index
    %c0_12 = arith.constant 0 : index
    %27 = vector.load %arg5[%c0_11, %c0_12] : memref<32x128xf32, #tpu.memory_space<vmem>>, vector<32x128xf32>
    tpu.vector_store %arg5[%c0_11, %c0_12], %26 {strides = array<i32>} : memref<32x128xf32, #tpu.memory_space<vmem>>, vector<32x128xf32>,
    %c1_i32 = arith.constant 1 : i32
    %28 = arith.cmpi eq, %arg1, %c1_i32 : i32
    %29 = arith.extui %28 : i1 to i32
    %c0_i32_13 = arith.constant 0 : i32
    %30 = arith.cmpi ne, %29, %c0_i32_13 : i32
    scf.if %30 {
      %c0_14 = arith.constant 0 : index
      %c0_15 = arith.constant 0 : index
      %31 = vector.load %arg5[%c0_14, %c0_15] : memref<32x128xf32, #tpu.memory_space<vmem>>, vector<32x128xf32>
      %32 = vector.shape_cast %31 : vector<32x128xf32> to vector<1x32x128xf32>
      %cst_16 = arith.constant dense<0.000000e+00> : vector<1xf32>
      %33 = vector.multi_reduction <add>, %32, %cst_16 [1, 2] : vector<1x32x128xf32> to vector<1xf32>
      %34 = vector.shape_cast %33 : vector<1xf32> to vector<1x1x1xf32>
      %35 = vector.extract %34[0, 0, 0] : f32 from vector<1x1x1xf32>
      %36 = vector.broadcast %35 : f32 to vector<1x8x128xf32>
      %c0_17 = arith.constant 0 : index
      %c0_18 = arith.constant 0 : index
      %c0_19 = arith.constant 0 : index
      %37 = vector.load %arg4[%c0_17, %c0_18, %c0_19] : memref<1x8x128xf32, #tpu.memory_space<vmem>>, vector<1x8x128xf32>
      tpu.vector_store %arg4[%c0_17, %c0_18, %c0_19], %36 {strides = array<i32>} : memref<1x8x128xf32, #tpu.memory_space<vmem>>, vector<1x8x128xf32>,
    } else {
    }
    return
  }
  func.func @transform_0(%arg0: i32, %arg1: i32) -> (i32, i32) {
    %c0_i32 = arith.constant 0 : i32
    return %arg0, %arg1 : i32, i32
  }
  func.func @transform_1(%arg0: i32, %arg1: i32) -> (i32, i32) {
    %c0_i32 = arith.constant 0 : i32
    return %arg0, %arg1 : i32, i32
  }
  func.func @transform_2(%arg0: i32, %arg1: i32) -> (i32, i32, i32) {
    %c0_i32 = arith.constant 0 : i32
    %c0_i32_0 = arith.constant 0 : i32
    %c0_i32_1 = arith.constant 0 : i32
    return %arg0, %c0_i32, %c0_i32_0 : i32, i32, i32
  }
}

</mosaic_0001>

<bundles_post_ra>
// kernel: tpu_custom_call.1
= control target key start
LH: loop header
LB: loop body
LE: loop exit
PB: predicated region body
PF: predicated region fallthrough
CT: control target
= control target key end

     0   :  { %s1028_s0 = inlined_call_operand.hbm [shape: bf16[64,256], index: 0, kind: input, shape index: {}]   ;;  %s1029_s1 = inlined_call_operand.hbm [shape: s8[64,256], index: 1, kind: input, shape index: {}]   ;;  %s1030_s2 = inlined_call_operand.hbm [shape: f32[2,8,128], index: 2, kind: output, shape index: {}]  }
   0x1   :  { %1036 = sst [smem:[#allocation19_spill]] %s1028_s0 }
   0x2   :  { %7 = vsyncpa [#allocation4], 0 }
   0x3   :  { %9 = vsyncpa [#allocation4 + $0x1], 0 }
   0x4   :  { %10 = vsyncpa [#allocation7], 0 }
   0x5   :  { %12 = vsyncpa [#allocation7 + $0x1], 0 }
   0x6   :  { %13 = vsyncpa [#allocation5], 0 }
   0x7   :  { %15 = vsyncpa [#allocation5 + $0x1], 0  ;;  %s818_s9 = smov 0   ;;  %s820_s10 = smov 0  }
   0x8   :  { %s822_s11 = smov 0   ;;  %s824_s12 = smov 0  }
   0x9   :  { %s826_s13 = smov 0   ;;  %s828_s14 = smov 0  }
   0xa   :  { %s830_s15 = smov 0   ;;  %s832_s16 = smov 0  }
   0xb   :  { %s834_s17 = smov 0   ;;  %s836_s18 = smov 0  }
   0xc   :  { %s838_s19 = smov 0  }
   0xd LB: > { %1037 = sst [smem:[#allocation12_spill]] %s765_s11  ;;  %s459_s20 = sadd.s32 4294967295, %s797_s19   ;;  %s797_s19 = sphi %s838_s19, %s21_s19   ;;  %s793_s18 = sphi %s836_s18, %s1064_s18   ;;  %s789_s17 = sphi %s834_s17, %s1063_s17   ;;  %s785_s16 = sphi %s832_s16, %s1062_s16   ;;  %s781_s15 = sphi %s830_s15, %s1061_s15   ;;  %s777_s14 = sphi %s828_s14, %s1054_s14   ;;  %s773_s13 = sphi %s826_s13, %s1060_s13   ;;  %s769_s12 = sphi %s824_s12, %s1059_s12   ;;  %s765_s11 = sphi %s822_s11, %s1052_s11   ;;  %s761_s10 = sphi %s820_s10, %s1058_s10   ;;  %s757_s9 = sphi %s818_s9, %s1057_s9  }
   0xe   : > { %1038 = sst [smem:[#allocation13_spill]] %s777_s14  ;;  %s460_s21 = sadd.s32 4294967294, %s797_s19  }
   0xf   : > { %s30_s22 = sadd.s32 1, %s789_s17  ;;  %s33_s23 = sadd.s32 1, %s793_s18 }
  0x10   : > { %p31_p0 = scmp.ge.s32.totalorder %s30_s22, 2  ;;  %s42_s24 = sadd.s32 1, %s777_s14 }
  0x11   : > { %p49_p1 = scmp.ne.s32.totalorder %s777_s14, %s773_s13  ;;  %p50_p2 = scmp.eq.s32.totalorder %s797_s19, 0 }
  0x12   : > { %s1066_s22 = smov (%p31_p0, %s30_s22), 0  ;;  %s1068_s23 = smov (!%p31_p0, %s33_s23), %s793_s18 }
  0x13   : > { %1039 = sst [smem:[#allocation14_spill]] %s1066_s22  ;;  %s38_s25 = ssub.s32 %s789_s17, %s1066_s22 }
  0x14   : > { %p884_p3 = por %p50_p2, %p49_p1  ;;  %p35_p4 = scmp.ge.s32.totalorder %s1068_s23, 2 }
  0x15   : > { %p55_p5 = scmp.ne.s32.totalorder %s773_s13, %s769_s12  ;;  %p56_p6 = scmp.eq.s32.totalorder %s459_s20, 0 }
  0x16   : > { %s96_s27 = sadd.s32 1, %s765_s11  ;;  %s1070_s23 = smov (%p35_p4, %s1068_s23), 0 }
  0x17   : > { %1041 = sst [smem:[#allocation15_spill]] %s1070_s23  ;;  %p892_p7 = por %p56_p6, %p55_p5 }
  0x18   : > { %p106_p8 = scmp.ne.s32.totalorder %s765_s11, %s761_s10  ;;  %s37_s29 = ssub.s32 %s793_s18, %s1070_s23 }
  0x19   : > { %p107_p9 = scmp.eq.s32.totalorder %s459_s20, 3  ;;  %s39_s30 = sor.u32 %s38_s25, %s37_s29 }
  0x1a   : > { %p94_p10 = scmp.eq.s32.totalorder %s37_s29, 0  ;;  %p40_p11 = scmp.eq.s32.totalorder %s39_s30, 0 }
  0x1b   : > { %p900_p12 = por %p107_p9, %p106_p8  ;;  %p112_p13 = scmp.ne.s32.totalorder %s761_s10, %s757_s9 }
  0x1c   : > { %s905_s4 = scalar_select %p94_p10, %s765_s11, %s96_s27  }
  0x1d   : > { %s908_s5 = scalar_select %p40_p11, %s777_s14, %s42_s24  }
  0x1e   : > { %1044 = sst [smem:[#allocation16_spill]] %s905_s4  ;;  %p113_p0 = scmp.eq.s32.totalorder %s460_s21, 3 }
  0x1f   : > { %1045 = sst [smem:[#allocation17_spill]] %s908_s5  ;;  %p509_p1 = scmp.lt.s32.totalorder %s797_s19, 4 }
  0x20   : > { %p913_p2 = por %p113_p0, %p112_p13  ;;  %s918_s7 = sand.u32 1, %s777_s14  }
  0x21   : > { %s463_s8 = sshll.u32 %s918_s7, 4  ;;  %s480_s12 = sshll.u32 %s793_s18, 3 }
  0x22   : > { %s1046_s6 = scalar_select %p913_p2, 1, 0 }
  0x23   : > { %s142_s20 = sadd.s32 %s789_s17, %s480_s12  ;;  %s137_s25 = scalar_lea.vmem [#allocation3], %s463_s8 }
  0x24   : > { %1047 = sst [smem:[#allocation18_spill]] %s1046_s6  ;;  %s147_s24 = sshll.u32 %s137_s25, 4  ;;  %s148_s24 = int_to_ptr.vmem [resolvable:$true] %s147_s24 }
  0x25   : > { %s466_s27 = sshll.u32 %s142_s20, 2  ;;  %s1048_s0 = sld [smem:[#allocation19_spill]] }
  0x26   : > { %p928_p4 = pnand %p509_p1, %p884_p3  ;;  %s134_s12 = scalar_lea.sflag [#allocation4], %s918_s7 }
  0x27   : > { %s799_s5 = smov 128   ;;  %s800_s8 = smov 64  }
  0x28   : > { %s801_s25 = smov 4   ;;  %p470_p5 = scmp.ge.s32.totalorder %s797_s19, 1 }
  0x29   : > { %p176_p6 = scmp.lt.s32.totalorder %s797_s19, 5  ;;  %s467_s20 = sshll.u32 %s918_s7, 3 }
  0x2a   : > { %s468_s26 = sshll.u32 %s793_s18, 1  ;;  %s158_s6 = scalar_lea.sflag [#allocation7], %s918_s7 }
  0x2b   : > { %s144_s30 = scalar_lea.hbm %s1048_s0, %s466_s27  ;;  %p177_p8 = pnand %p470_p5, %p176_p6 }
  0x2c   : > { %s145_s22 = sshll.u32 %s144_s30, 4  ;;  %s161_s27 = scalar_lea.vmem [#allocation6], %s467_s20  ;;  %s146_s22 = int_to_ptr.hbm [resolvable:$true] %s145_s22 }
  0x2d   : > { %501 = dma.hbm_to_vmem [thread:$0]  (!%p928_p4), %s146_s22, 256, %s148_s24, %s134_s12, %s799_s5, %s800_s8, %s801_s25  }
  0x2e   : > { %s171_s21 = sshll.u32 %s161_s27, 4  ;;  %s165_s29 = sadd.s32 %s789_s17, %s468_s26  ;;  %s172_s21 = int_to_ptr.vmem [resolvable:$true] %s171_s21 }
  0x2f   : > { %s469_s0 = sshll.u32 %s165_s29, 3  ;;  %180 = sbr.rel (%p177_p8) target bundleno = 303 (0x12f), region = 28 }
  0x30   : > { %s167_s4 = scalar_lea.hbm %s1029_s1, %s469_s0  ;;  %s182_s22 = sand.u32 (!%p177_p8), 1, %s773_s13  }
  0x31   : > { %s169_s11 = sshll.u32 %s167_s4, 4  ;;  %s471_s5 = sshll.u32 (!%p177_p8), %s182_s22, 4  ;;  %s170_s11 = int_to_ptr.hbm [resolvable:$true] %s169_s11 }
  0x32   : > { %504 = dma.hbm_to_vmem [thread:$0]  (!%p928_p4), %s170_s11, 128, %s172_s21, %s158_s6  }
  0x33   : > { %s183_s24 = scalar_lea.sflag (!%p177_p8), [#allocation4], %s182_s22  ;;  %s186_s12 = scalar_lea.vmem (!%p177_p8), [#allocation3], %s471_s5 }
  0x34   : > { %744 = dma.done.wait (%p892_p7), %s183_s24, 256  }
  0x35   : > { %746 = vsyncadd (%p892_p7), %s183_s24, 4294967040  ;;  %s472_s0 = sshll.u32 %s182_s22, 3  ;;  %s193_s14 = scalar_lea.sflag [#allocation7], %s182_s22 }
  0x36   : > { %s196_s4 = scalar_lea.vmem [#allocation6], %s472_s0 }
  0x37   : > { %748 = dma.done.wait (%p892_p7), %s193_s14, 128  }
  0x38   : > { %750 = vsyncadd (%p892_p7), %s193_s14, 4294967168  ;;  %s220_s11 = sand.u32 1, %s761_s10   ;;  %p474_p3 = scmp.ne.s32.totalorder %s781_s15, 0 }
  0x39   : > { %s958_s23 = sshll.u32 %s220_s11, 3 }
  0x3a   : > { %s222_s6 = scalar_lea.vmem [#allocation8], %s958_s23  ;;  %227 = sbr.rel (%p474_p3) target bundleno = 68 (0x44), region = 40 }
  0x3f   : > { %v802_v0 = vmov 0.0  }
  0x40   : > { %228 = vst [vmem:[#allocation2 + $0x10] sm:$0xff] %v802_v0 }
  0x41   : > { %229 = vst [vmem:[#allocation2] sm:$0xff] %v802_v0 }
  0x42   : > { %230 = vst [vmem:[#allocation2 + $0x18] sm:$0xff] %v802_v0 }
  0x43   : > { %231 = vst [vmem:[#allocation2 + $0x8] sm:$0xff] %v802_v0 }
  0x44 PF: > { %v482_v1 = vld [vmem:[%s186_s12] sm:$0xff]   ;;  %v489_v7 = vld [vmem:[%s186_s12 + $0x8] sm:$0xff]   ;;  %p475_p7 = scmp.ne.s32.totalorder %s781_s15, 1 }
  0x45   : > { %v240_v2 = vld [vmem:[%s196_s4] sm:$0xff]  ;;  %v483_v3 = vunpack.c.l.bf16 %v482_v1  ;;  %v484_v5 = vunpack.c.h.bf16 %v482_v1  ;;  %v487_v8 = vunpack.c.l.bf16 %v489_v7  ;;  %v488_v10 = vunpack.c.h.bf16 %v489_v7 }
  0x46   : > { %v241_v4 = vunpack.c.0.s8 %v240_v2  ;;  %v242_v6 = vunpack.c.1.s8 %v240_v2  ;;  %v243_v9 = vunpack.c.2.s8 %v240_v2  ;;  %v244_v11 = vunpack.c.3.s8 %v240_v2 }
  0x47   : > { %v249_v13 = vsub.f32 1.0, %v483_v3  ;;  %v250_v15 = vsub.f32 1.0, %v484_v5  ;;  %v251_v17 = vsub.f32 1.0, %v487_v8  ;;  %v252_v19 = vsub.f32 1.0, %v488_v10  ;;  %v301_v54 = vld [vmem:[#allocation2 + $0x10] sm:$0xff] }
  0x48   : > { %v245_v12 = vcvt.s32.f32 %v241_v4  ;;  %v246_v14 = vcvt.s32.f32 %v242_v6  ;;  %v247_v16 = vcvt.s32.f32 %v243_v9  ;;  %v248_v18 = vcvt.s32.f32 %v244_v11  ;;  %v302_v59 = vld [vmem:[#allocation2] sm:$0xff] }
  0x49   : > { %v253_v20 = vadd.f32 0.05, %v249_v13  ;;  %v254_v21 = vadd.f32 0.05, %v250_v15  ;;  %v255_v22 = vadd.f32 0.05, %v251_v17 }
  0x4a   : > { %vm261_vm0 = vcmp.gt.f32.partialorder %v245_v12, 0.5  ;;  %vm262_vm1 = vcmp.gt.f32.partialorder %v246_v14, 0.5  ;;  %v256_v23 = vadd.f32 0.05, %v252_v19  ;;  %vm263_vm2 = vcmp.gt.f32.partialorder %v247_v16, 0.5  ;;  %v303_v63 = vld [vmem:[#allocation2 + $0x18] sm:$0xff] }
  0x4b   : > { %v257_v24 = vmin.f32 %v253_v20, 1.0  ;;  %v258_v25 = vmin.f32 %v254_v21, 1.0  ;;  %v259_v26 = vmin.f32 %v255_v22, 1.0  ;;  %vm264_vm3 = vcmp.gt.f32.partialorder %v248_v18, 0.5 }
  0x4c   : > { %v260_v27 = vmin.f32 %v256_v23, 1.0 }
  0x4d   : > { %v265_v28 = vsel %vm261_vm0, %v483_v3, %v257_v24  ;;  %v266_v29 = vsel %vm262_vm1, %v484_v5, %v258_v25  ;;  %v267_v34 = vsel %vm263_vm2, %v487_v8, %v259_v26  ;;  %v304_v3 = vld [vmem:[#allocation2 + $0x8] sm:$0xff] }
  0x4e   : > { %v269_v30 = vmax.f32 %v265_v28, 1e-08  ;;  %v281_v31 = vsub.f32 1.0, %v265_v28  ;;  %v270_v32 = vmax.f32 %v266_v29, 1e-08  ;;  %v282_v33 = vsub.f32 1.0, %v266_v29 }
  0x4f   : > { %v268_v35 = vsel %vm264_vm3, %v488_v10, %v260_v27  ;;  %v271_v38 = vmax.f32 %v267_v34, 1e-08  ;;  %v283_v39 = vsub.f32 1.0, %v267_v34 }
  0x50   : > { %603 = vlog2.f32 %v269_v30  ;;  %v285_v36 = vmul.f32 %v281_v31, %v281_v31  ;;  %v286_v37 = vmul.f32 %v282_v33, %v282_v33  ;;  %v272_v40 = vmax.f32 %v268_v35, 1e-08 }
  0x51   : > { %605 = vlog2.f32 %v270_v32  ;;  %v284_v41 = vsub.f32 1.0, %v268_v35  ;;  %v287_v44 = vmul.f32 %v283_v39, %v283_v39 }
  0x52   : > { %v289_v42 = vmul.f32 %v285_v36, %v285_v36  ;;  %607 = vlog2.f32 %v271_v38  ;;  %v290_v43 = vmul.f32 %v286_v37, %v286_v37 }
  0x53   : > { %609 = vlog2.f32 %v272_v40  ;;  %v288_v45 = vmul.f32 %v284_v41, %v284_v41  ;;  %v291_v46 = vmul.f32 %v287_v44, %v287_v44 }
  0x54   : > { %v293_v49 = vsel %vm261_vm0, %v281_v31, %v289_v42  ;;  %v294_v52 = vsel %vm262_vm1, %v282_v33, %v290_v43 }
  0x55   : > { %v292_v47 = vmul.f32 %v288_v45, %v288_v45  ;;  %v295_v56 = vsel %vm263_vm2, %v283_v39, %v291_v46 }
  0x56   : > { %v604_v48 = vpop.eup %603 }
  0x57   : > { %v606_v50 = vpop.eup %605  ;;  %v274_v51 = vmul.f32 0.6931472, %v604_v48  ;;  %v296_v61 = vsel %vm264_vm3, %v284_v41, %v292_v47 }
  0x58   : > { %v608_v53 = vpop.eup %607  ;;  %v276_v55 = vmul.f32 0.6931472, %v606_v50 }
  0x59   : > { %v610_v57 = vpop.eup %609  ;;  %v297_v58 = vmul.f32 %v293_v49, %v274_v51  ;;  %v278_v60 = vmul.f32 0.6931472, %v608_v53 }
  0x5a   : > { %v298_v62 = vmul.f32 %v294_v52, %v276_v55  ;;  %v280_v0 = vmul.f32 0.6931472, %v610_v57 }
  0x5b   : > { %v305_v1 = vadd.f32 %v301_v54, %v297_v58  ;;  %v299_v2 = vmul.f32 %v295_v56, %v278_v60 }
  0x5c   : > { %v306_v4 = vadd.f32 %v302_v59, %v298_v62  ;;  %v300_v5 = vmul.f32 %v296_v61, %v280_v0  ;;  %316 = sbr.rel (%p475_p7) target bundleno = 288 (0x120), region = 44 }
  0x5d   : > { %309 = vst [vmem:[#allocation2 + $0x10] sm:$0xff] %v305_v1  ;;  %v307_v6 = vadd.f32 %v303_v63, %v299_v2 }
  0x5e   : > { %310 = vst [vmem:[#allocation2] sm:$0xff] %v306_v4  ;;  %v308_v7 = vadd.f32 %v304_v3, %v300_v5 }
  0x5f   : > { %311 = vst [vmem:[#allocation2 + $0x18] sm:$0xff] %v307_v6 }
  0x60   : > { %312 = vst [vmem:[#allocation2 + $0x8] sm:$0xff] %v308_v7 }
  0x64   : > { %v317_v8 = vld [vmem:[#allocation2 + $0x10] sm:$0xff] }
  0x65   : > { %v318_v9 = vld [vmem:[#allocation2] sm:$0xff] }
  0x66   : > { %v319_v10 = vld [vmem:[#allocation2 + $0x18] sm:$0xff]  ;;  %v321_v11 = vadd.f32 %v318_v9, %v317_v8 }
  0x67   : > { %v320_v12 = vld [vmem:[#allocation2 + $0x8] sm:$0xff] }
  0x68   : > { %v322_v13 = vadd.f32 %v321_v11, %v319_v10 }
  0x6a   : > { %v323_v14 = vadd.f32 %v322_v13, %v320_v12 }
  0x6c   : > { %324 = vadd.xlane.f32.xlu0 %v323_v14 }
  0xdf   : > { %v325_v15 = vpop.xlane.xlu0 %324 }
  0xe0   : > { %v326_v16 = vrot.slane %v325_v15, 4 }
  0xe2   : > { %v327_v17 = vadd.f32 %v326_v16, %v325_v15 }
  0xe4   : > { %v328_v18 = vrot.slane %v327_v17, 2 }
  0xe6   : > { %v329_v19 = vadd.f32 %v328_v18, %v327_v17 }
  0xe8   : > { %v330_v20 = vrot.slane %v329_v19, 1 }
  0xea   : > { %v331_v21 = vadd.f32 %v330_v20, %v329_v19 }
  0xec   : > { %490 = vpush %v331_v21 }
 0x11d   : > { %s491_s28 = spop %490 }
 0x11e   : > { %v333_v22 = vstv %s491_s28 }
 0x11f   : > { %334 = vst [vmem:[%s222_s6] sm:$0xff] %v333_v22 }
 0x120 PF: > { %s477_s15 = sshll.u32 %s785_s16, 3  ;;  %s348_s20 = sshll.u32 %s222_s6, 4  ;;  %s349_s20 = int_to_ptr.vmem [resolvable:$true] %s348_s20 }
 0x121   : > { %s346_s25 = scalar_lea.hbm %s1030_s2, %s477_s15  ;;  %s336_s27 = scalar_lea.sflag [#allocation5], %s220_s11 }
 0x122   : > { %s350_s26 = sshll.u32 %s346_s25, 4  ;;  %s691_s22 = scalar_lea.hbm %s1030_s2, 16  ;;  %s351_s26 = int_to_ptr.hbm [resolvable:$true] %s350_s26 }
 0x123   : > { %s685_s21 = sshra.s32 %s351_s26, 4  ;;  %s686_s21 = int_to_ptr.hbm [resolvable:$true] %s685_s21 }
 0x124   : > { %s687_s29 = scalar_lea.hbm %s686_s21, 8  ;;  %p692_p13 = scmp.lt.s32.totalorder %s686_s21, %s1030_s2 }
 0x125   : > { %p688_p9 = scmp.ne.s32.totalorder %s686_s21, %s687_s29  ;;  %p693_p0 = scmp.lt.s32.totalorder %s691_s22, %s687_s29 }
 0x127   : > { %p689_p10 = pnand %p688_p9, %p900_p12  ;;  %p694_p1 = por %p693_p0, %p692_p13 }
 0x129   : > { %p690_p11 = pneg %p689_p10 }
 0x12b   : > { %p695_p4 = pnand %p694_p1, %p690_p11 }
 0x12d   : > { %698 = shalt.err (!%p695_p4)
}
 0x12e   : > { %496 = dma.vmem_to_hbm [thread:$0]  (%p900_p12), %s349_s20, 128, %s351_s26, %s336_s27  }
 0x12f PF: > { %p510_p5 = scmp.ge.s32.totalorder %s797_s19, 2  ;;  %s362_s0 = sand.u32 1, %s757_s9  }
 0x130   : > { %s363_s14 = scalar_lea.sflag [#allocation5], %s362_s0 }
 0x131   : > { %p506_p6 = pnand %p510_p5, %p913_p2 }
 0x133   : > { %p507_p8 = pneg %p506_p6 }
 0x135   : > { %752 = dma.done.wait (%p507_p8), %s363_s14, 128  }
 0x136   : > { %754 = vsyncadd (%p507_p8), %s363_s14, 4294967168  ;;  %s21_s19 = sadd.s32 1, %s797_s19   ;;  %s1051_s4 = sld [smem:[#allocation12_spill]] }
 0x137   : > { %p18_p3 = scmp.ge.s32.totalorder %s21_s19, 6   ;;  %s1052_s11 = sld [smem:[#allocation16_spill]] }
 0x138   : > { %s1053_s3 = sld [smem:[#allocation13_spill]]  ;;  %s1057_s9 = smov %s761_s10 }
 0x139   : > { %s1054_s14 = sld [smem:[#allocation17_spill]]  ;;  %s1059_s12 = smov %s773_s13 }
 0x13a   : > { %s1055_s23 = sld [smem:[#allocation14_spill]]  ;;  %s1061_s15 = smov %s789_s17 }
 0x13b   : > { %s1056_s6 = sld [smem:[#allocation15_spill]]  ;;  %s1062_s16 = smov %s793_s18 }
 0x13c   : > { %s1058_s10 = smov %s1051_s4 }
 0x13d   :  { %20 = sbr.rel (!%p18_p3) target bundleno = 13 (0xd), region = 94 }
 0x13e   : > { %s1060_s13 = smov %s1053_s3 }
 0x140   : > { %s1063_s17 = smov %s1055_s23 }
 0x141   : > { %s1064_s18 = smov %s1056_s6 }
 0x142   :  { %369 = vsyncpa [#allocation4], 1 }
 0x143   :  { %371 = vsyncpa [#allocation4 + $0x1], 1 }
 0x144   :  { %372 = vsyncpa [#allocation7], 1 }
 0x145   :  { %374 = vsyncpa [#allocation7 + $0x1], 1 }
 0x146   :  { %375 = vsyncpa [#allocation5], 1 }
 0x147   :  { %377 = vsyncpa [#allocation5 + $0x1], 1 }

</bundles_post_ra>
